<compile_context>
chip_gen: v5e
topology: v5e:2x2
jax: 0.10.0
libtpu: 0.0.40
codegen_flags: <defaults>
</compile_context>

<pallas_src>
import jax
import jax.numpy as jnp
from jax.experimental import pallas as pl
from jax.experimental.pallas import tpu as pltpu


def gc_fusion_kernel(xi_ref, xp_ref, wc_ref, bc_ref, wfp_ref, wfi_ref, bf_ref,
                     o_ref):
    # Activations arrive f32 from HBM; cast to bf16 in VMEM (cheap VPU work,
    # hidden under the HBM-bound pipeline) right before the MXU dots.
    xi = xi_ref[...].astype(jnp.bfloat16)        # (ic, tn)
    xp = xp_ref[...].astype(jnp.bfloat16)        # (pc, tn)

    # IA_Layer: att = gumbel_softmax(fc3(tanh(fc1(img)+fc2(pt)))) over a
    # size-1 dim == 1.0 exactly, so out = relu(BN(conv1(img))) * 1.0.
    # BN is pre-folded into wc/bc; bias/ReLU stay in f32.
    img = jnp.dot(wc_ref[...], xi, preferred_element_type=jnp.float32) + bc_ref[...]
    img = jnp.maximum(img, 0.0)                                   # (pc, tn) f32

    # GC_Fusion: conv1(concat([point, img], C)) == split matmul; BN folded.
    y = (jnp.dot(wfp_ref[...], xp, preferred_element_type=jnp.float32)
         + jnp.dot(wfi_ref[...], img.astype(wfi_ref.dtype),
                   preferred_element_type=jnp.float32)
         + bf_ref[...])                                           # (outp, tn) f32
    o_ref[...] = jnp.maximum(y, 0.0).astype(o_ref.dtype)


def _pick_tile_n(N, B, tn_request):
    """Lane tile: multiple of 128, as big as possible for long DMA rows, but
    small enough that the (B, N-tiles) grid has >= 4 steps (v7x: 2 TCs)."""
    n_lanes = max(128, -(-N // 128) * 128)                   # N rounded up to 128
    tn = min(max(128, (tn_request // 128) * 128), n_lanes)
    while tn > 128 and B * (-(-N // tn)) < 4:
        tn = max(128, (tn // 2) // 128 * 128)
    return tn


def gc_fusion_conv(point_features, img_features, params, *, tn=2048,
                   out_dtype=jnp.bfloat16):
    """point_features: (B, pc, N), img_features: (B, ic, N) -> (B, outp, N)."""
    B, pc, N = point_features.shape
    _, ic, _ = img_features.shape
    outp = params["wf_p"].shape[0]

    tn = _pick_tile_n(N, B, tn)
    n_tiles = pl.cdiv(N, tn)

    # Fold BatchNorm (inference mode) into the 1x1 conv weights/biases.
    # Fold in f32, then cast the (tiny) weights to bf16 for the MXU.
    wc = (params["wc"] * params["scale_i"][:, None]).astype(jnp.bfloat16)      # (pc, ic)
    bc = (params["bc"] * params["scale_i"]
          + params["shift_i"])[:, None].astype(jnp.float32)                    # (pc, 1)
    wfp = (params["wf_p"] * params["scale_f"][:, None]).astype(jnp.bfloat16)   # (outp, pc)
    wfi = (params["wf_i"] * params["scale_f"][:, None]).astype(jnp.bfloat16)   # (outp, pc)
    bf = (params["bf"] * params["scale_f"]
          + params["shift_f"])[:, None].astype(jnp.float32)                    # (outp, 1)

    ii = img_features.dtype.itemsize
    pi = point_features.dtype.itemsize
    oi = jnp.dtype(out_dtype).itemsize
    weight_bytes = int(wc.nbytes + wfp.nbytes + wfi.nbytes + bc.nbytes + bf.nbytes)

    # Scheduling hint for XLA around the (otherwise opaque) custom call.
    cost = pl.CostEstimate(
        flops=2 * B * N * (pc * ic + outp * 2 * pc),
        transcendentals=0,
        bytes_accessed=B * N * (ic * ii + pc * pi + outp * oi) + weight_bytes,
    )

    # Explicit VMEM budget: double-buffered activation/output tiles + weights
    # + in-kernel f32 intermediates, plus headroom; capped at v7x's 64 MiB.
    vmem_need = (2 * tn * (ic * ii + pc * pi + outp * oi)
                 + tn * (pc + outp) * 4
                 + 4 * weight_bytes)
    vmem_limit = int(min(64 * 1024 * 1024, max(vmem_need + (4 << 20), 8 << 20)))

    resident = lambda r, c: pl.BlockSpec((r, c), lambda b, j: (0, 0))
    grid_spec = pltpu.PrefetchScalarGridSpec(
        num_scalar_prefetch=0,
        grid=(B, n_tiles),
        in_specs=[
            pl.BlockSpec((None, ic, tn), lambda b, j: (b, 0, j)),
            pl.BlockSpec((None, pc, tn), lambda b, j: (b, 0, j)),
            resident(pc, ic), resident(pc, 1),
            resident(outp, pc), resident(outp, pc), resident(outp, 1),
        ],
        out_specs=pl.BlockSpec((None, outp, tn), lambda b, j: (b, 0, j)),
    )

    return pl.pallas_call(
        gc_fusion_kernel,
        out_shape=jax.ShapeDtypeStruct((B, outp, N), out_dtype),
        grid_spec=grid_spec,
        cost_estimate=cost,
        compiler_params=pltpu.CompilerParams(
            dimension_semantics=("parallel", "parallel"),
            vmem_limit_bytes=vmem_limit),
    )(img_features, point_features, wc, bc, wfp, wfi, bf)


def gc_fusion_conv_ref(point_features, img_features, p):
    """Pure-JAX f32 reference (att == 1.0 exactly, see header comment)."""
    img = jnp.einsum("oi,bin->bon", p["wc"], img_features) + p["bc"][None, :, None]
    img = jax.nn.relu(img * p["scale_i"][None, :, None] + p["shift_i"][None, :, None])
    y = (jnp.einsum("op,bpn->bon", p["wf_p"], point_features)
         + jnp.einsum("op,bpn->bon", p["wf_i"], img)
         + p["bf"][None, :, None])
    return jax.nn.relu(y * p["scale_f"][None, :, None] + p["shift_f"][None, :, None])


def make_params(key, ic, pc, outp):
    rc = pc // 4
    ks = jax.random.split(key, 19)
    eps = 1e-5

    def bn_fold(kg, kb, km, kv, c):
        gamma = 1.0 + 0.1 * jax.random.normal(kg, (c,), jnp.float32)
        beta = 0.1 * jax.random.normal(kb, (c,), jnp.float32)
        mean = 0.1 * jax.random.normal(km, (c,), jnp.float32)
        var = 1.0 + 0.1 * jax.random.uniform(kv, (c,), jnp.float32)
        scale = gamma / jnp.sqrt(var + eps)
        shift = beta - mean * scale
        return scale, shift

    si, shi = bn_fold(ks[8], ks[9], ks[10], ks[11], pc)      # IA_Layer BN
    sf, shf = bn_fold(ks[12], ks[13], ks[14], ks[15], outp)  # final BN

    return {
        # IA_Layer attention fc1/fc2/fc3 — mathematically inert in the forward
        # pass (att == 1.0 since gumbel_softmax acts on a size-1 dim); kept
        # only to mirror the PyTorch module's parameter structure.
        "w1": 0.1 * jax.random.normal(ks[0], (rc, ic), jnp.float32),
        "b1": 0.1 * jax.random.normal(ks[1], (rc,), jnp.float32),
        "w2": 0.1 * jax.random.normal(ks[2], (rc, pc), jnp.float32),
        "b2": 0.1 * jax.random.normal(ks[3], (rc,), jnp.float32),
        "w3": 0.1 * jax.random.normal(ks[4], (1, rc), jnp.float32),
        "b3": 0.1 * jax.random.normal(ks[5], (1,), jnp.float32),
        # IA_Layer conv1: 1x1 Conv1d ic->pc, stored channel-major (out, in)
        "wc": 0.1 * jax.random.normal(ks[6], (pc, ic), jnp.float32),
        "bc": 0.1 * jax.random.normal(ks[7], (pc,), jnp.float32),
        "scale_i": si, "shift_i": shi,
        # GC_Fusion conv1: 1x1 Conv1d 2*pc->outp, split into [point | img] halves
        "wf_p": 0.1 * jax.random.normal(ks[16], (outp, pc), jnp.float32),
        "wf_i": 0.1 * jax.random.normal(ks[17], (outp, pc), jnp.float32),
        "bf": 0.1 * jax.random.normal(ks[18], (outp,), jnp.float32),
        "scale_f": sf, "shift_f": shf,
    }


if __name__ == "__main__":
    key = jax.random.PRNGKey(0)
    B, N = 2, 1024
    inplanes_I, inplanes_P, outplanes = 32, 64, 32

    kp, ki, kw = jax.random.split(key, 3)
    point_features = jax.random.normal(kp, (B, inplanes_P, N), jnp.float32)
    img_features = jax.random.normal(ki, (B, inplanes_I, N), jnp.float32)
    params = make_params(kw, inplanes_I, inplanes_P, outplanes)

    out = gc_fusion_conv(point_features, img_features, params)
    jax.block_until_ready(out)
    assert out.shape == (B, outplanes, N)

    ref = gc_fusion_conv_ref(point_features, img_features, params)
    max_err = float(jnp.max(jnp.abs(out.astype(jnp.float32) - ref)))
    denom = float(jnp.max(jnp.abs(ref))) + 1e-6
    assert max_err / denom < 3e-2, f"relative err too large: {max_err / denom}"
    print("KERNEL_OK")
</pallas_src>

<mosaic_0001>
module attributes {stable_mosaic.version = 11 : i64} {
  func.func @gc_fusion_kernel(%arg0: i32, %arg1: i32, %arg2: memref<1x32x512xf32, #tpu.memory_space<vmem>>, %arg3: memref<1x64x512xf32, #tpu.memory_space<vmem>>, %arg4: memref<64x32xbf16, #tpu.memory_space<vmem>>, %arg5: memref<64x1xf32, #tpu.memory_space<vmem>>, %arg6: memref<32x64xbf16, #tpu.memory_space<vmem>>, %arg7: memref<32x64xbf16, #tpu.memory_space<vmem>>, %arg8: memref<32x1xf32, #tpu.memory_space<vmem>>, %arg9: memref<1x32x512xbf16, #tpu.memory_space<vmem>>) attributes {dimension_semantics = [#tpu.dimension_semantics<parallel>, #tpu.dimension_semantics<parallel>], iteration_bounds = array<i64: 2, 2>, scalar_prefetch = 0 : i64, scratch_operands = 0 : i64, tpu.core_type = #tpu.core_type<tc>, window_params = [{transform_indices = @transform_0, window_bounds = array<i64: 1, 32, 512>}, {transform_indices = @transform_1, window_bounds = array<i64: 1, 64, 512>}, {pipeline_mode = #tpu.pipeline_mode<synchronous>, transform_indices = @transform_2, window_bounds = array<i64: 64, 32>}, {pipeline_mode = #tpu.pipeline_mode<synchronous>, transform_indices = @transform_3, window_bounds = array<i64: 64, 1>}, {pipeline_mode = #tpu.pipeline_mode<synchronous>, transform_indices = @transform_4, window_bounds = array<i64: 32, 64>}, {pipeline_mode = #tpu.pipeline_mode<synchronous>, transform_indices = @transform_5, window_bounds = array<i64: 32, 64>}, {pipeline_mode = #tpu.pipeline_mode<synchronous>, transform_indices = @transform_6, window_bounds = array<i64: 32, 1>}, {transform_indices = @transform_7, window_bounds = array<i64: 1, 32, 512>}]} {
    %c0 = arith.constant 0 : index
    %c0_0 = arith.constant 0 : index
    %c0_1 = arith.constant 0 : index
    %0 = vector.load %arg2[%c0, %c0_0, %c0_1] : memref<1x32x512xf32, #tpu.memory_space<vmem>>, vector<1x32x512xf32>
    %1 = vector.shape_cast %0 : vector<1x32x512xf32> to vector<32x512xf32>
    %2 = arith.truncf %1 : vector<32x512xf32> to vector<32x512xbf16>
    %c0_2 = arith.constant 0 : index
    %c0_3 = arith.constant 0 : index
    %c0_4 = arith.constant 0 : index
    %3 = vector.load %arg3[%c0_2, %c0_3, %c0_4] : memref<1x64x512xf32, #tpu.memory_space<vmem>>, vector<1x64x512xf32>
    %4 = vector.shape_cast %3 : vector<1x64x512xf32> to vector<64x512xf32>
    %5 = arith.truncf %4 : vector<64x512xf32> to vector<64x512xbf16>
    %c0_5 = arith.constant 0 : index
    %c0_6 = arith.constant 0 : index
    %6 = vector.load %arg4[%c0_5, %c0_6] : memref<64x32xbf16, #tpu.memory_space<vmem>>, vector<64x32xbf16>
    %cst = arith.constant dense<0.000000e+00> : vector<64x512xf32>
    %7 = tpu.matmul %6, %2, %cst {dimension_numbers = #tpu.dot_dimension_numbers<[1], [0], [0], [1], [0, 0, 1, 1], [], []>} : vector<64x32xbf16>, vector<32x512xbf16>, vector<64x512xf32> -> vector<64x512xf32>
    %c0_7 = arith.constant 0 : index
    %c0_8 = arith.constant 0 : index
    %8 = vector.load %arg5[%c0_7, %c0_8] : memref<64x1xf32, #tpu.memory_space<vmem>>, vector<64x1xf32>
    %9 = vector.broadcast %8 : vector<64x1xf32> to vector<64x512xf32>
    %10 = arith.addf %7, %9 : vector<64x512xf32>
    %cst_9 = arith.constant 0.000000e+00 : f32
    %11 = vector.broadcast %cst_9 : f32 to vector<64x512xf32>
    %12 = arith.maximumf %10, %11 : vector<64x512xf32>
    %c0_10 = arith.constant 0 : index
    %c0_11 = arith.constant 0 : index
    %13 = vector.load %arg6[%c0_10, %c0_11] : memref<32x64xbf16, #tpu.memory_space<vmem>>, vector<32x64xbf16>
    %cst_12 = arith.constant dense<0.000000e+00> : vector<32x512xf32>
    %14 = tpu.matmul %13, %5, %cst_12 {dimension_numbers = #tpu.dot_dimension_numbers<[1], [0], [0], [1], [0, 0, 1, 1], [], []>} : vector<32x64xbf16>, vector<64x512xbf16>, vector<32x512xf32> -> vector<32x512xf32>
    %c0_13 = arith.constant 0 : index
    %c0_14 = arith.constant 0 : index
    %15 = vector.load %arg7[%c0_13, %c0_14] : memref<32x64xbf16, #tpu.memory_space<vmem>>, vector<32x64xbf16>
    %16 = arith.truncf %12 : vector<64x512xf32> to vector<64x512xbf16>
    %cst_15 = arith.constant dense<0.000000e+00> : vector<32x512xf32>
    %17 = tpu.matmul %15, %16, %cst_15 {dimension_numbers = #tpu.dot_dimension_numbers<[1], [0], [0], [1], [0, 0, 1, 1], [], []>} : vector<32x64xbf16>, vector<64x512xbf16>, vector<32x512xf32> -> vector<32x512xf32>
    %18 = arith.addf %14, %17 : vector<32x512xf32>
    %c0_16 = arith.constant 0 : index
    %c0_17 = arith.constant 0 : index
    %19 = vector.load %arg8[%c0_16, %c0_17] : memref<32x1xf32, #tpu.memory_space<vmem>>, vector<32x1xf32>
    %20 = vector.broadcast %19 : vector<32x1xf32> to vector<32x512xf32>
    %21 = arith.addf %18, %20 : vector<32x512xf32>
    %cst_18 = arith.constant 0.000000e+00 : f32
    %22 = vector.broadcast %cst_18 : f32 to vector<32x512xf32>
    %23 = arith.maximumf %21, %22 : vector<32x512xf32>
    %24 = arith.truncf %23 : vector<32x512xf32> to vector<32x512xbf16>
    %c0_19 = arith.constant 0 : index
    %c0_20 = arith.constant 0 : index
    %c0_21 = arith.constant 0 : index
    %25 = vector.load %arg9[%c0_19, %c0_20, %c0_21] : memref<1x32x512xbf16, #tpu.memory_space<vmem>>, vector<1x32x512xbf16>
    %26 = vector.shape_cast %25 : vector<1x32x512xbf16> to vector<32x512xbf16>
    %27 = vector.shape_cast %24 : vector<32x512xbf16> to vector<1x32x512xbf16>
    tpu.vector_store %arg9[%c0_19, %c0_20, %c0_21], %27 {strides = array<i32>} : memref<1x32x512xbf16, #tpu.memory_space<vmem>>, vector<1x32x512xbf16>,
    return
  }
  func.func @transform_0(%arg0: i32, %arg1: i32) -> (i32, i32, i32) {
    %c0_i32 = arith.constant 0 : i32
    %c0_i32_0 = arith.constant 0 : i32
    return %arg0, %c0_i32, %arg1 : i32, i32, i32
  }
  func.func @transform_1(%arg0: i32, %arg1: i32) -> (i32, i32, i32) {
    %c0_i32 = arith.constant 0 : i32
    %c0_i32_0 = arith.constant 0 : i32
    return %arg0, %c0_i32, %arg1 : i32, i32, i32
  }
  func.func @transform_2(%arg0: i32, %arg1: i32) -> (i32, i32) {
    %c0_i32 = arith.constant 0 : i32
    %c0_i32_0 = arith.constant 0 : i32
    %c0_i32_1 = arith.constant 0 : i32
    return %c0_i32, %c0_i32_0 : i32, i32
  }
  func.func @transform_3(%arg0: i32, %arg1: i32) -> (i32, i32) {
    %c0_i32 = arith.constant 0 : i32
    %c0_i32_0 = arith.constant 0 : i32
    %c0_i32_1 = arith.constant 0 : i32
    return %c0_i32, %c0_i32_0 : i32, i32
  }
  func.func @transform_4(%arg0: i32, %arg1: i32) -> (i32, i32) {
    %c0_i32 = arith.constant 0 : i32
    %c0_i32_0 = arith.constant 0 : i32
    %c0_i32_1 = arith.constant 0 : i32
    return %c0_i32, %c0_i32_0 : i32, i32
  }
  func.func @transform_5(%arg0: i32, %arg1: i32) -> (i32, i32) {
    %c0_i32 = arith.constant 0 : i32
    %c0_i32_0 = arith.constant 0 : i32
    %c0_i32_1 = arith.constant 0 : i32
    return %c0_i32, %c0_i32_0 : i32, i32
  }
  func.func @transform_6(%arg0: i32, %arg1: i32) -> (i32, i32) {
    %c0_i32 = arith.constant 0 : i32
    %c0_i32_0 = arith.constant 0 : i32
    %c0_i32_1 = arith.constant 0 : i32
    return %c0_i32, %c0_i32_0 : i32, i32
  }
  func.func @transform_7(%arg0: i32, %arg1: i32) -> (i32, i32, i32) {
    %c0_i32 = arith.constant 0 : i32
    %c0_i32_0 = arith.constant 0 : i32
    return %arg0, %c0_i32, %arg1 : i32, i32, i32
  }
}

</mosaic_0001>

<bundles_post_ra>
// kernel: tpu_custom_call.1
= control target key start
LH: loop header
LB: loop body
LE: loop exit
PB: predicated region body
PF: predicated region fallthrough
CT: control target
= control target key end

     0   :  { %s1886_s0 = inlined_call_operand.hbm [shape: f32[2,32,1024], index: 0, kind: input, shape index: {}]   ;;  %s1887_s1 = inlined_call_operand.hbm [shape: f32[2,64,1024], index: 1, kind: input, shape index: {}]   ;;  %s1888_s2 = inlined_call_operand.vmem [shape: bf16[64,32], index: 2, kind: input, shape index: {}]   ;;  %s1889_s3 = inlined_call_operand.vmem [shape: f32[64,1], index: 3, kind: input, shape index: {}]   ;;  %s1890_s4 = inlined_call_operand.vmem [shape: bf16[32,64], index: 4, kind: input, shape index: {}]   ;;  %s1891_s5 = inlined_call_operand.vmem [shape: bf16[32,64], index: 5, kind: input, shape index: {}]   ;;  %s1892_s6 = inlined_call_operand.vmem [shape: f32[32,1], index: 6, kind: input, shape index: {}]   ;;  %s1893_s7 = inlined_call_operand.hbm [shape: bf16[2,32,1024], index: 7, kind: output, shape index: {}]  }
   0x1   :  { %1903 = sst [smem:[#allocation20_spill]] %s1886_s0 }
   0x2   :  { %1904 = sst [smem:[#allocation21_spill]] %s1893_s7 }
   0x3   :  { %12 = vsyncpa [#allocation3], 0 }
   0x4   :  { %14 = vsyncpa [#allocation3 + $0x1], 0 }
   0x5   :  { %15 = vsyncpa [#allocation6], 0 }
   0x6   :  { %17 = vsyncpa [#allocation6 + $0x1], 0 }
   0x7   :  { %18 = vsyncpa [#allocation4], 0 }
   0x8   :  { %20 = vsyncpa [#allocation4 + $0x1], 0  ;;  %s1489_s24 = smov 0   ;;  %s1491_s25 = smov 0  }
   0x9   :  { %s1493_s26 = smov 0   ;;  %s1495_s27 = smov 0  }
   0xa   :  { %s1497_s28 = smov 0   ;;  %s1499_s29 = smov 0  }
   0xb   :  { %s1501_s30 = smov 0   ;;  %s1503_s8 = smov 0  }
   0xc LB: > { %1905 = sst [smem:[#allocation11_spill]] %s1412_s24  ;;  %s1091_s9 = sadd.s32 4294967295, %s1440_s8   ;;  %s1440_s8 = sphi %s1503_s8, %s26_s8   ;;  %s1436_s30 = sphi %s1501_s30, %s1934_s30   ;;  %s1432_s29 = sphi %s1499_s29, %s1928_s29   ;;  %s1428_s28 = sphi %s1497_s28, %s1933_s28   ;;  %s1424_s27 = sphi %s1495_s27, %s1932_s27   ;;  %s1420_s26 = sphi %s1493_s26, %s1926_s26   ;;  %s1416_s25 = sphi %s1491_s25, %s1931_s25   ;;  %s1412_s24 = sphi %s1489_s24, %s1930_s24  }
   0xd   : > { %1906 = sst [smem:[#allocation12_spill]] %s1420_s26  ;;  %s1092_s10 = sadd.s32 4294967294, %s1440_s8  }
   0xe   : > { %1907 = sst [smem:[#allocation13_spill]] %s1428_s28  ;;  %s35_s11 = sadd.s32 1, %s1432_s29 }
   0xf   : > { %1908 = sst [smem:[#allocation14_spill]] %s1432_s29  ;;  %s38_s12 = sadd.s32 1, %s1436_s30 }
  0x10   : > { %p36_p0 = scmp.ge.s32.totalorder %s35_s11, 2  ;;  %s47_s13 = sadd.s32 1, %s1420_s26 }
  0x11   : > { %p54_p1 = scmp.ne.s32.totalorder %s1420_s26, %s1416_s25  ;;  %p55_p2 = scmp.eq.s32.totalorder %s1440_s8, 0 }
  0x12   : > { %s1936_s11 = smov (%p36_p0, %s35_s11), 0  ;;  %s1938_s12 = smov (!%p36_p0, %s38_s12), %s1436_s30 }
  0x13   : > { %1909 = sst [smem:[#allocation15_spill]] %s1936_s11  ;;  %s43_s14 = ssub.s32 %s1432_s29, %s1936_s11 }
  0x14   : > { %p1542_p3 = por %p55_p2, %p54_p1  ;;  %p40_p4 = scmp.ge.s32.totalorder %s1938_s12, 2 }
  0x15   : > { %p60_p5 = scmp.ne.s32.totalorder %s1416_s25, %s1412_s24  ;;  %p61_p6 = scmp.eq.s32.totalorder %s1091_s9, 0 }
  0x16   : > { %p219_p7 = scmp.eq.s32.totalorder %s1091_s9, 3  ;;  %s1940_s12 = smov (%p40_p4, %s1938_s12), 0 }
  0x17   : > { %1911 = sst [smem:[#allocation16_spill]] %s1940_s12  ;;  %p1550_p8 = por %p61_p6, %p60_p5 }
  0x18   : > { %p1554_p9 = por %p219_p7, %p54_p1  ;;  %s42_s18 = ssub.s32 %s1436_s30, %s1940_s12 }
  0x19   : > { %p225_p10 = scmp.eq.s32.totalorder %s1092_s10, 3  ;;  %s44_s19 = sor.u32 %s43_s14, %s42_s18 }
  0x1a   : > { %s1913_s17 = scalar_select %p1554_p9, 1, 0 }
  0x1b   : > { %p45_p11 = scmp.eq.s32.totalorder %s44_s19, 0  ;;  %p1560_p12 = por %p225_p10, %p60_p5 }
  0x1c   : > { %1914 = sst [smem:[#allocation17_spill]] %s1913_s17  ;;  %p1202_p13 = scmp.lt.s32.totalorder %s1440_s8, 4 }
  0x1d   : > { %s1915_s20 = scalar_select %p1560_p12, 1, 0 }
  0x1e   : > { %s1566_s21 = sand.u32 1, %s1420_s26   ;;  %s1096_s9 = sshll.u32 %s1432_s29, 2 }
  0x1f   : > { %1916 = sst [smem:[#allocation18_spill]] %s1915_s20  ;;  %s1095_s23 = sshll.u32 %s1566_s21, 7 }
  0x20   : > { %s1569_s22 = scalar_select %p45_p11, %s1420_s26, %s47_s13  }
  0x21   : > { %s1097_s11 = sshll.u32 %s1436_s30, 5  ;;  %s264_s12 = scalar_lea.vmem [#allocation2], %s1095_s23 }
  0x22   : > { %1917 = sst [smem:[#allocation19_spill]] %s1569_s22  ;;  %s274_s10 = sshll.u32 %s264_s12, 4  ;;  %s275_s10 = int_to_ptr.vmem [resolvable:$true] %s274_s10 }
  0x23   : > { %s269_s14 = sadd.s32 %s1097_s11, %s1096_s9  ;;  %p1576_p0 = pnand %p1202_p13, %p1542_p3 }
  0x24   : > { %s1098_s18 = sshll.u32 %s269_s14, 3  ;;  %s1919_s0 = sld [smem:[#allocation20_spill]] }
  0x25   : > { %p1103_p1 = scmp.ge.s32.totalorder %s1440_s8, 1  ;;  %s261_s23 = scalar_lea.sflag [#allocation3], %s1566_s21 }
  0x26   : > { %s1442_s22 = smov 1024   ;;  %s1443_s12 = smov 512  }
  0x27   : > { %s1444_s11 = smov 32   ;;  %p306_p2 = scmp.lt.s32.totalorder %s1440_s8, 5 }
  0x28   : > { %s1099_s15 = sshll.u32 %s1566_s21, 8  ;;  %s1101_s14 = sshll.u32 %s1436_s30, 6 }
  0x29   : > { %p307_p3 = pnand %p1103_p1, %p306_p2  ;;  %s293_s26 = sadd.s32 %s1101_s14, %s1096_s9 }
  0x2a   : > { %s271_s13 = scalar_lea.hbm %s1919_s0, %s1098_s18  ;;  %s288_s17 = scalar_lea.vmem [#allocation5], %s1099_s15 }
  0x2b   : > { %s272_s29 = sshll.u32 %s271_s13, 4  ;;  %s298_s24 = sshll.u32 %s288_s17, 4  ;;  %s273_s29 = int_to_ptr.hbm [resolvable:$true] %s272_s29  ;;  %s299_s24 = int_to_ptr.vmem [resolvable:$true] %s298_s24 }
  0x2c   : > { %1194 = dma.hbm_to_vmem [thread:$0]  (!%p1576_p0), %s273_s29, 2048, %s275_s10, %s261_s23, %s1442_s22, %s1443_s12, %s1444_s11  }
  0x2d   : > { %s1102_s20 = sshll.u32 %s293_s26, 3  ;;  %s285_s28 = scalar_lea.sflag [#allocation6], %s1566_s21 }
  0x2e   : > { %s295_s0 = scalar_lea.hbm %s1887_s1, %s1102_s20  ;;  %310 = sbr.rel (%p307_p3) target bundleno = 478 (0x1de), region = 48 }
  0x2f   : > { %s296_s7 = sshll.u32 %s295_s0, 4  ;;  %s1597_s29 = sand.u32 (!%p307_p3), 1, %s1416_s25   ;;  %s297_s7 = int_to_ptr.hbm [resolvable:$true] %s296_s7 }
  0x30   : > { %1197 = dma.hbm_to_vmem [thread:$0]  (!%p1576_p0), %s297_s7, 4096, %s299_s24, %s285_s28, %s1442_s22, %s1443_s12, %s1444_s11  }
  0x31   : > { %s1104_s9 = sshll.u32 (!%p307_p3), %s1597_s29, 7  ;;  %s313_s17 = scalar_lea.sflag (!%p307_p3), [#allocation3], %s1597_s29 }
  0x32   : > { %s1601_s26 = scalar_lea.vmem (!%p307_p3), [#allocation2], %s1104_s9 }
  0x33   : > { %1399 = dma.done.wait (%p1550_p8), %s313_s17, 2048  }
  0x34   : > { %1401 = vsyncadd (%p1550_p8), %s313_s17, 4294965248  ;;  %s1105_s0 = sshll.u32 %s1597_s29, 8  ;;  %s323_s7 = scalar_lea.sflag [#allocation6], %s1597_s29 }
  0x35   : > { %s1609_s28 = scalar_lea.vmem [#allocation5], %s1105_s0 }
  0x36   : > { %1403 = dma.done.wait (%p1550_p8), %s323_s7, 4096  }
  0x37   : > { %1405 = vsyncadd (%p1550_p8), %s323_s7, 4294963200  ;;  %v1445_v0 = vmov 0   ;;  %v375_v1 = vld [vmem:[%s1601_s26 + $0x40] sm:$0xff]  ;;  %v376_v3 = vld [vmem:[%s1601_s26 + $0x48] sm:$0xff]  ;;  %vm515_vm0 = vcmask 261120   ;;  %vm710_vm1 = vcmask 523264  }
  0x38   : > { %1275 = vset.pattern.permute.xlu0 %v1445_v0  ;;  %1276 = vset.pattern.permute.xlu1 %v1445_v0  ;;  %v379_v2 = vld [vmem:[%s1601_s26 + $0x60] sm:$0xff]  ;;  %v380_v5 = vld [vmem:[%s1601_s26 + $0x68] sm:$0xff]  ;;  %v377_v6 = vld [vmem:[%s1601_s26 + $0x50] sm:$0xff]  ;;  %s1106_s21 = sshll.u32 %s1597_s29, 6  ;;  %s1920_s10 = sld [smem:[#allocation13_spill]] }
  0x39   : > { %1277 = vset.pattern.permute.xlu2 %v1445_v0  ;;  %v387_v4 = vpack.c.bf16 %v379_v2, %v375_v1  ;;  %v381_v7 = vld [vmem:[%s1601_s26 + $0x70] sm:$0xff]  ;;  %v388_v8 = vpack.c.bf16 %v380_v5, %v376_v3  ;;  %v378_v10 = vld [vmem:[%s1601_s26 + $0x58] sm:$0xff]  ;;  %v367_v12 = vld [vmem:[%s1601_s26] sm:$0xff]  ;;  %s1827_s22 = scalar_lea.vmem [#allocation7], %s1106_s21  ;;  %s1172_s19 = sshll.u32 %s1424_s27, 2 }
  0x3a   : > { %v389_v9 = vpack.c.bf16 %v381_v7, %v377_v6  ;;  %v382_v11 = vld [vmem:[%s1601_s26 + $0x78] sm:$0xff]  ;;  %v371_v14 = vld [vmem:[%s1601_s26 + $0x20] sm:$0xff]  ;;  %v368_v15 = vld [vmem:[%s1601_s26 + $0x8] sm:$0xff]  ;;  %s1921_s14 = sld [smem:[#allocation21_spill]]  ;;  %s972_s18 = sshll.u32 %s1827_s22, 4  ;;  %s973_s18 = int_to_ptr.vmem [resolvable:$true] %s972_s18 }
  0x3b   : > { %534 = vmatpush.bf16.msra.mxu0 %v387_v4  ;;  %v390_v13 = vpack.c.bf16 %v382_v11, %v378_v10  ;;  %v372_v16 = vld [vmem:[%s1601_s26 + $0x28] sm:$0xff]  ;;  %563 = vmatpush.bf16.msra.mxu1 %v388_v8  ;;  %v383_v17 = vpack.c.bf16 %v371_v14, %v367_v12  ;;  %v369_v19 = vld [vmem:[%s1601_s26 + $0x10] sm:$0xff]  ;;  %v370_v21 = vld [vmem:[%s1601_s26 + $0x18] sm:$0xff]  ;;  %s958_s9 = scalar_lea.sflag [#allocation4], %s1597_s29 }
  0x3c   : > { %592 = vmatpush.bf16.msra.mxu2 %v389_v9  ;;  %v384_v18 = vpack.c.bf16 %v372_v16, %v368_v15  ;;  %v373_v20 = vld [vmem:[%s1601_s26 + $0x30] sm:$0xff]  ;;  %v374_v23 = vld [vmem:[%s1601_s26 + $0x38] sm:$0xff]  ;;  %v1177_v26 = vld [vmem:[%s1888_s2] sm:$0xff] }
  0x3d   : > { %621 = vmatpush.bf16.msra.mxu3 %v390_v13  ;;  %v385_v22 = vpack.c.bf16 %v373_v20, %v369_v19  ;;  %v453_v24 = vld [vmem:[%s1889_s3 + $0x30] sm:$0xff]  ;;  %v386_v25 = vpack.c.bf16 %v374_v23, %v370_v21  ;;  %v451_v27 = vld [vmem:[%s1889_s3 + $0x20] sm:$0xff]  ;;  %v454_v28 = vld [vmem:[%s1889_s3 + $0x38] sm:$0xff] }
  0x3e   : > { %487 = vperm.xlu0 %1275, %v453_v24   ;;  %477 = vperm.xlu1 %1276, %v451_v27   ;;  %v452_v29 = vld [vmem:[%s1889_s3 + $0x28] sm:$0xff]  ;;  %v447_v30 = vld [vmem:[%s1889_s3] sm:$0xff]  ;;  %v449_v33 = vld [vmem:[%s1889_s3 + $0x10] sm:$0xff]  ;;  %s1173_s23 = sshll.u32 %s1920_s10, 5 }
  0x3f   : > { %535 = vmatpush.bf16.msra.mxu0 %v383_v17  ;;  %564 = vmatpush.bf16.msra.mxu1 %v384_v18  ;;  %v448_v31 = vld [vmem:[%s1889_s3 + $0x8] sm:$0xff]  ;;  %v887_v35 = vld [vmem:[%s1892_s6 + $0x10] sm:$0xff]  ;;  %v450_v36 = vld [vmem:[%s1889_s3 + $0x18] sm:$0xff]  ;;  %s969_s12 = sadd.s32 %s1173_s23, %s1172_s19 }
  0x40   : > { %593 = vmatpush.bf16.msra.mxu2 %v385_v22  ;;  %v1178_v32 = vld [vmem:[%s1888_s2 + $0x8] sm:$0xff]  ;;  %467 = vperm.xlu2 %1277, %v449_v33   ;;  %v1179_v37 = vld [vmem:[%s1888_s2 + $0x10] sm:$0xff]  ;;  %v885_v38 = vld [vmem:[%s1892_s6] sm:$0xff]  ;;  %s1174_s11 = sshll.u32 %s969_s12, 2  ;;  %s1358_s7 = scalar_lea.hbm %s1921_s14, 256 }
  0x41   : > { %622 = vmatpush.bf16.msra.mxu3 %v386_v25  ;;  %v886_v34 = vld [vmem:[%s1892_s6 + $0x8] sm:$0xff]  ;;  %v1180_v39 = vld [vmem:[%s1888_s2 + $0x18] sm:$0xff]  ;;  %s971_s24 = scalar_lea.hbm %s1921_s14, %s1174_s11 }
  0x42   : > { %1123 = vmatmul.msk.bf16.vlgmr.msra.gmra.mxu0 %vm515_vm0, %v1177_v26  ;;  %1127 = vmatmul.msk.bf16.vlgmr.msra.gmra.mxu1 %vm515_vm0, %v1177_v26  ;;  %v888_v40 = vld [vmem:[%s1892_s6 + $0x18] sm:$0xff]  ;;  %s974_s13 = sshll.u32 %s971_s24, 4  ;;  %s975_s13 = int_to_ptr.hbm [resolvable:$true] %s974_s13 }
  0x43   : > { %1131 = vmatmul.msk.bf16.vlgmr.msra.gmra.mxu2 %vm515_vm0, %v1177_v26  ;;  %s1352_s17 = sshra.s32 %s975_s13, 4  ;;  %s1353_s17 = int_to_ptr.hbm [resolvable:$true] %s1352_s17 }
  0x44   : > { %1135 = vmatmul.msk.bf16.vlgmr.msra.gmra.mxu3 %vm515_vm0, %v1177_v26  ;;  %s1354_s26 = scalar_lea.hbm %s1353_s17, 64  ;;  %p1359_p7 = scmp.lt.s32.totalorder %s1353_s17, %s1921_s14 }
  0x45   : > { %p1355_p4 = scmp.ne.s32.totalorder %s1353_s17, %s1354_s26  ;;  %p1360_p8 = scmp.lt.s32.totalorder %s1358_s7, %s1354_s26 }
  0x46   : > { %492 = vperm.xlu0 %1275, %v454_v28   ;;  %482 = vperm.xlu1 %1276, %v452_v29  }
  0x47   : > { %p1356_p5 = pnand %p1355_p4, %p1554_p9  ;;  %p1361_p10 = por %p1360_p8, %p1359_p7 }
  0x48   : > { %472 = vperm.xlu2 %1277, %v450_v36  }
  0x49   : > { %p1357_p6 = pneg %p1356_p5 }
  0x4b   : > { %p1362_p11 = pnand %p1361_p10, %p1357_p6 }
  0x4e   : > { %457 = vperm.xlu0 %1275, %v447_v30   ;;  %462 = vperm.xlu1 %1276, %v448_v31  }
  0x50   : > { %891 = vperm.xlu2 %1277, %v885_v38  }
  0x52   : > { %1124 = vmatmul.msk.bf16.gmra.mxu0 %vm515_vm0, %v1178_v32  ;;  %1128 = vmatmul.msk.bf16.gmra.mxu1 %vm515_vm0, %v1178_v32 }
  0x53   : > { %1132 = vmatmul.msk.bf16.gmra.mxu2 %vm515_vm0, %v1178_v32 }
  0x54   : > { %1136 = vmatmul.msk.bf16.gmra.mxu3 %vm515_vm0, %v1178_v32 }
  0x56   : > { %896 = vperm.xlu0 %1275, %v886_v34   ;;  %901 = vperm.xlu1 %1276, %v887_v35  }
  0x58   : > { %906 = vperm.xlu2 %1277, %v888_v40  }
  0x62   : > { %1125 = vmatmul.msk.bf16.gmra.mxu0 %vm515_vm0, %v1179_v37  ;;  %1129 = vmatmul.msk.bf16.gmra.mxu1 %vm515_vm0, %v1179_v37 }
  0x63   : > { %1133 = vmatmul.msk.bf16.gmra.mxu2 %vm515_vm0, %v1179_v37 }
  0x64   : > { %1137 = vmatmul.msk.bf16.gmra.mxu3 %vm515_vm0, %v1179_v37 }
  0x72   : > { %1126 = vmatmul.msk.bf16.gmra.mxu0 %vm515_vm0, %v1180_v39  ;;  %1130 = vmatmul.msk.bf16.gmra.mxu1 %vm515_vm0, %v1180_v39 }
  0x73   : > { %1134 = vmatmul.msk.bf16.gmra.mxu2 %vm515_vm0, %v1180_v39 }
  0x74   : > { %1138 = vmatmul.msk.bf16.gmra.mxu3 %vm515_vm0, %v1180_v39 }
  0x9a   : > { %v1719_v2 = vpop.permute.xlu2 %467 }
  0xa2   : > { %v473_v15 = vpop.permute.xlu2 %472 }
  0xb0   : > { %v488_v59 = vpop.permute.xlu0 %487  ;;  %v1715_v60 = vpop.permute.xlu1 %477 }
  0xb8   : > { %v493_v1 = vpop.permute.xlu0 %492  ;;  %v483_v7 = vpop.permute.xlu1 %482 }
  0xbf   : > { %v537_v41 = vpop.f32.mrf.mxu0  ;;  %v566_v42 = vpop.f32.mrf.mxu1 }
  0xc0   : > { %v1721_v8 = vpop.permute.xlu0 %457  ;;  %v1733_v28 = vpop.permute.xlu1 %462 }
  0xc1   : > { %v1724_v11 = vadd.f32 %v537_v41, %v1721_v8  ;;  %v1729_v23 = vadd.f32 %v566_v42, %v1721_v8 }
  0xc3   : > { %v644_v27 = vmax.f32 %v1724_v11, 0.0 }
  0xc6   : > { %v1695_v43 = vpop.f32.mrf.mxu2 }
  0xc7   : > { %v1697_v44 = vpop.f32.mrf.mxu3  ;;  %v1699_v45 = vpop.f32.mrf.mxu0 }
  0xc8   : > { %v1701_v46 = vpop.f32.mrf.mxu1 }
  0xce   : > { %v1703_v47 = vpop.f32.mrf.mxu2 }
  0xcf   : > { %v1705_v48 = vpop.f32.mrf.mxu3  ;;  %v542_v49 = vpop.f32.mrf.mxu0 }
  0xd0   : > { %v571_v50 = vpop.f32.mrf.mxu1  ;;  %v543_v26 = vadd.f32 %v542_v49, %v1719_v2 }
  0xd1   : > { %v572_v32 = vadd.f32 %v571_v50, %v1719_v2 }
  0xd2   : > { %v652_v49 = vmax.f32 %v543_v26, 0.0  ;;  %v598_v26 = vadd.f32 %v1703_v47, %v1733_v28 }
  0xd6   : > { %v1707_v51 = vpop.f32.mrf.mxu2 }
  0xd7   : > { %v1709_v52 = vpop.f32.mrf.mxu3  ;;  %v544_v53 = vpop.f32.mrf.mxu0 }
  0xd8   : > { %v573_v54 = vpop.f32.mrf.mxu1  ;;  %v545_v31 = vadd.f32 %v544_v53, %v473_v15  ;;  %v569_v53 = vadd.f32 %v1701_v46, %v1733_v28 }
  0xd9   : > { %v574_v36 = vadd.f32 %v573_v54, %v473_v15  ;;  %v653_v54 = vmax.f32 %v572_v32, 0.0 }
  0xde   : > { %v1711_v55 = vpop.f32.mrf.mxu2 }
  0xdf   : > { %v1713_v56 = vpop.f32.mrf.mxu3  ;;  %v547_v57 = vpop.f32.mrf.mxu0 }
  0xe0   : > { %v576_v58 = vpop.f32.mrf.mxu1  ;;  %v548_v16 = vadd.f32 %v547_v57, %v1715_v60  ;;  %v540_v57 = vadd.f32 %v1699_v45, %v1733_v28 }
  0xe1   : > { %v577_v20 = vadd.f32 %v576_v58, %v1715_v60 }
  0xe2   : > { %v660_v33 = vmax.f32 %v548_v16, 0.0  ;;  %v603_v16 = vadd.f32 %v1711_v55, %v473_v15 }
  0xe3   : > { %v661_v37 = vmax.f32 %v577_v20, 0.0  ;;  %v415_v20 = vld [vmem:[%s1609_s28 + $0xc0] sm:$0xff] }
  0xe6   : > { %v605_v61 = vpop.f32.mrf.mxu2 }
  0xe7   : > { %v1717_v62 = vpop.f32.mrf.mxu3  ;;  %v549_v63 = vpop.f32.mrf.mxu0 }
  0xe8   : > { %v578_v0 = vpop.f32.mrf.mxu1  ;;  %v550_v17 = vadd.f32 %v549_v63, %v483_v7  ;;  %v635_v45 = vadd.f32 %v1717_v62, %v1715_v60  ;;  %v601_v62 = vadd.f32 %v1707_v51, %v1719_v2  ;;  %v658_v51 = vmax.f32 %v603_v16, 0.0  ;;  %v395_v16 = vld [vmem:[%s1609_s28 + $0x20] sm:$0xff] }
  0xe9   : > { %v579_v21 = vadd.f32 %v578_v0, %v483_v7  ;;  %v656_v0 = vmax.f32 %v545_v31, 0.0  ;;  %v627_v31 = vadd.f32 %v1705_v48, %v1733_v28  ;;  %v412_v48 = vld [vmem:[%s1609_s28 + $0xa8] sm:$0xff]  ;;  %v625_v28 = vadd.f32 %v1697_v44, %v1721_v8 }
  0xea   : > { %v664_v34 = vmax.f32 %v550_v17, 0.0 }
  0xeb   : > { %v665_v38 = vmax.f32 %v579_v21, 0.0 }
  0xee   : > { %v607_v3 = vpop.f32.mrf.mxu2 }
  0xef   : > { %v636_v4 = vpop.f32.mrf.mxu3  ;;  %v552_v5 = vpop.f32.mrf.mxu0  ;;  %v608_v58 = vadd.f32 %v607_v3, %v483_v7 }
  0xf0   : > { %v581_v6 = vpop.f32.mrf.mxu1  ;;  %v553_v9 = vadd.f32 %v552_v5, %v488_v59  ;;  %v637_v5 = vadd.f32 %v636_v4, %v483_v7  ;;  %v632_v7 = vadd.f32 %v1713_v56, %v473_v15  ;;  %v663_v56 = vmax.f32 %v635_v45, 0.0 }
  0xf1   : > { %v582_v12 = vadd.f32 %v581_v6, %v488_v59 }
  0xf2   : > { %v668_v24 = vmax.f32 %v553_v9, 0.0  ;;  %v692_v9 = vpack.c.bf16 %v664_v34, %v660_v33  ;;  %v667_v17 = vmax.f32 %v637_v5, 0.0  ;;  %v659_v32 = vmax.f32 %v632_v7, 0.0 }
  0xf3   : > { %v669_v29 = vmax.f32 %v582_v12, 0.0  ;;  %v647_v5 = vmax.f32 %v625_v28, 0.0 }
  0xf4   : > { %v695_v33 = vpack.c.bf16 %v667_v17, %v663_v56  ;;  %v1184_v56 = vld [vmem:[%s1891_s5 + $0x8] sm:$0xff] }
  0xf6   : > { %v610_v10 = vpop.f32.mrf.mxu2 }
  0xf7   : > { %v639_v13 = vpop.f32.mrf.mxu3  ;;  %v554_v14 = vpop.f32.mrf.mxu0  ;;  %v611_v39 = vadd.f32 %v610_v10, %v488_v59  ;;  %v657_v10 = vmax.f32 %v574_v36, 0.0  ;;  %v1183_v36 = vld [vmem:[%s1891_s5] sm:$0xff] }
  0xf8   : > { %v555_v18 = vadd.f32 %v554_v14, %v493_v1  ;;  %v583_v19 = vpop.f32.mrf.mxu1  ;;  %v640_v41 = vadd.f32 %v639_v13, %v488_v59  ;;  %v606_v59 = vadd.f32 %v605_v61, %v1715_v60  ;;  %v693_v13 = vpack.c.bf16 %v665_v38, %v661_v37  ;;  %v419_v60 = vld [vmem:[%s1609_s28 + $0xe0] sm:$0xff]  ;;  %v408_v37 = vld [vmem:[%s1609_s28 + $0x88] sm:$0xff] }
  0xf9   : > { %v584_v22 = vadd.f32 %v583_v19, %v493_v1  ;;  %v670_v11 = vmax.f32 %v611_v39, 0.0  ;;  %v648_v14 = vmax.f32 %v540_v57, 0.0  ;;  %v645_v61 = vmax.f32 %v1729_v23, 0.0 }
  0xfa   : > { %v672_v25 = vmax.f32 %v555_v18, 0.0  ;;  %v671_v46 = vmax.f32 %v640_v41, 0.0  ;;  %v688_v19 = vpack.c.bf16 %v656_v0, %v652_v49  ;;  %v662_v21 = vmax.f32 %v606_v59, 0.0  ;;  %v417_v41 = vld [vmem:[%s1609_s28 + $0xd0] sm:$0xff]  ;;  %v418_v49 = vld [vmem:[%s1609_s28 + $0xd8] sm:$0xff]  ;;  %v400_v0 = vld [vmem:[%s1609_s28 + $0x48] sm:$0xff] }
  0xfb   : > { %v673_v30 = vmax.f32 %v584_v22, 0.0  ;;  %v689_v55 = vpack.c.bf16 %v657_v10, %v653_v54  ;;  %v649_v22 = vmax.f32 %v569_v53, 0.0  ;;  %v630_v23 = vadd.f32 %v1709_v52, %v1719_v2  ;;  %v407_v52 = vld [vmem:[%s1609_s28 + $0x80] sm:$0xff]  ;;  %v404_v54 = vld [vmem:[%s1609_s28 + $0x68] sm:$0xff] }
  0xfc   : > { %v696_v35 = vpack.c.bf16 %v672_v25, %v668_v24  ;;  %v416_v24 = vld [vmem:[%s1609_s28 + $0xc8] sm:$0xff]  ;;  %v684_v15 = vpack.c.bf16 %v648_v14, %v644_v27  ;;  %v411_v2 = vld [vmem:[%s1609_s28 + $0xa0] sm:$0xff]  ;;  %v596_v27 = vadd.f32 %v1695_v43, %v1721_v8  ;;  %v650_v43 = vmax.f32 %v598_v26, 0.0  ;;  %v422_v8 = vld [vmem:[%s1609_s28 + $0xf8] sm:$0xff] }
  0xfd   : > { %v697_v40 = vpack.c.bf16 %v673_v30, %v669_v29  ;;  %v420_v25 = vld [vmem:[%s1609_s28 + $0xe8] sm:$0xff]  ;;  %v435_v30 = vpack.c.bf16 %v419_v60, %v415_v20  ;;  %v685_v47 = vpack.c.bf16 %v649_v22, %v645_v61  ;;  %v655_v38 = vmax.f32 %v630_v23, 0.0  ;;  %v391_v14 = vld [vmem:[%s1609_s28] sm:$0xff]  ;;  %v402_v60 = vld [vmem:[%s1609_s28 + $0x58] sm:$0xff] }
  0xfe   : > { %v612_v42 = vpop.f32.mrf.mxu2  ;;  %721 = vmatpush.bf16.msrb.mxu0 %v696_v35  ;;  %v436_v34 = vpack.c.bf16 %v420_v25, %v416_v24  ;;  %v654_v35 = vmax.f32 %v601_v62, 0.0  ;;  %v651_v57 = vmax.f32 %v627_v31, 0.0  ;;  %v432_v44 = vpack.c.bf16 %v412_v48, %v408_v37  ;;  %v406_v62 = vld [vmem:[%s1609_s28 + $0x78] sm:$0xff]  ;;  %v393_v22 = vld [vmem:[%s1609_s28 + $0x10] sm:$0xff] }
  0xff   : > { %v613_v50 = vadd.f32 %v612_v42, %v493_v1  ;;  %v641_v63 = vpop.f32.mrf.mxu3  ;;  %740 = vmatpush.bf16.msrb.mxu1 %v697_v40  ;;  %v431_v40 = vpack.c.bf16 %v411_v2, %v407_v52  ;;  %v421_v42 = vld [vmem:[%s1609_s28 + $0xf0] sm:$0xff]  ;;  %v691_v53 = vpack.c.bf16 %v659_v32, %v655_v38  ;;  %v438_v10 = vpack.c.bf16 %v422_v8, %v418_v49  ;;  %v394_v25 = vld [vmem:[%s1609_s28 + $0x18] sm:$0xff] }
 0x100   : > { %v642_v6 = vadd.f32 %v641_v63, %v493_v1  ;;  %v666_v1 = vmax.f32 %v608_v58, 0.0  ;;  %v690_v39 = vpack.c.bf16 %v658_v51, %v654_v35  ;;  %v399_v58 = vld [vmem:[%s1609_s28 + $0x40] sm:$0xff]  ;;  %v646_v63 = vmax.f32 %v596_v27, 0.0  ;;  %v397_v24 = vld [vmem:[%s1609_s28 + $0x30] sm:$0xff]  ;;  %v398_v23 = vld [vmem:[%s1609_s28 + $0x38] sm:$0xff] }
 0x101   : > { %v674_v12 = vmax.f32 %v613_v50, 0.0  ;;  %v403_v50 = vld [vmem:[%s1609_s28 + $0x60] sm:$0xff]  ;;  %v687_v45 = vpack.c.bf16 %v651_v57, %v647_v5  ;;  %v423_v17 = vpack.c.bf16 %v395_v16, %v391_v14  ;;  %v426_v26 = vpack.c.bf16 %v398_v23, %v394_v25 }
 0x102   : > { %v675_v3 = vmax.f32 %v642_v6, 0.0  ;;  %722 = vmatpush.bf16.msrb.mxu0 %v692_v9  ;;  %v694_v29 = vpack.c.bf16 %v666_v1, %v662_v21  ;;  %v437_v6 = vpack.c.bf16 %v421_v42, %v417_v41  ;;  %v686_v9 = vpack.c.bf16 %v650_v43, %v646_v63  ;;  %v392_v1 = vld [vmem:[%s1609_s28 + $0x8] sm:$0xff]  ;;  %v1181_v51 = vld [vmem:[%s1890_s4] sm:$0xff] }
 0x103   : > { %741 = vmatpush.bf16.msrb.mxu1 %v693_v13  ;;  %v698_v4 = vpack.c.bf16 %v674_v12, %v670_v11  ;;  %v427_v59 = vpack.c.bf16 %v403_v50, %v399_v58  ;;  %v409_v11 = vld [vmem:[%s1609_s28 + $0x90] sm:$0xff]  ;;  %v410_v13 = vld [vmem:[%s1609_s28 + $0x98] sm:$0xff] }
 0x104   : > { %v699_v18 = vpack.c.bf16 %v675_v3, %v671_v46  ;;  %v413_v12 = vld [vmem:[%s1609_s28 + $0xb0] sm:$0xff]  ;;  %v428_v46 = vpack.c.bf16 %v404_v54, %v400_v0  ;;  %v414_v3 = vld [vmem:[%s1609_s28 + $0xb8] sm:$0xff]  ;;  %v897_v54 = vpop.permute.xlu0 %896 }
 0x105   : > { %759 = vmatpush.bf16.msrb.mxu2 %v698_v4  ;;  %v396_v4 = vld [vmem:[%s1609_s28 + $0x28] sm:$0xff]  ;;  %v433_v61 = vpack.c.bf16 %v413_v12, %v409_v11  ;;  %v434_v7 = vpack.c.bf16 %v414_v3, %v410_v13 }
 0x106   : > { %778 = vmatpush.bf16.msrb.mxu3 %v699_v18  ;;  %723 = vmatpush.bf16.msrb.mxu0 %v688_v19  ;;  %v401_v18 = vld [vmem:[%s1609_s28 + $0x50] sm:$0xff]  ;;  %v424_v20 = vpack.c.bf16 %v396_v4, %v392_v1 }
 0x107   : > { %742 = vmatpush.bf16.msrb.mxu1 %v689_v55  ;;  %v405_v19 = vld [vmem:[%s1609_s28 + $0x70] sm:$0xff]  ;;  %v430_v55 = vpack.c.bf16 %v406_v62, %v402_v60 }
 0x108   : > { %v429_v21 = vpack.c.bf16 %v405_v19, %v401_v18 }
 0x109   : > { %760 = vmatpush.bf16.msrb.mxu2 %v694_v29  ;;  %v1182_v29 = vld [vmem:[%s1890_s4 + $0x8] sm:$0xff] }
 0x10a   : > { %779 = vmatpush.bf16.msrb.mxu3 %v695_v33  ;;  %724 = vmatpush.bf16.msrb.mxu0 %v684_v15  ;;  %v425_v15 = vpack.c.bf16 %v397_v24, %v393_v22 }
 0x10b   : > { %743 = vmatpush.bf16.msrb.mxu1 %v685_v47 }
 0x10d   : > { %761 = vmatpush.bf16.msrb.mxu2 %v690_v39  ;;  %1147 = vmatmul.msk.bf16.vlgmr.msrb.gmra.mxu0 %vm710_vm1, %v1183_v36 }
 0x10e   : > { %813 = vmatpush.bf16.msra.mxu0 %v435_v30  ;;  %780 = vmatpush.bf16.msrb.mxu3 %v691_v53 }
 0x10f   : > { %832 = vmatpush.bf16.msra.mxu1 %v436_v34 }
 0x110   : > { %1149 = vmatmul.msk.bf16.vlgmr.msrb.gmra.mxu1 %vm710_vm1, %v1183_v36 }
 0x111   : > { %762 = vmatpush.bf16.msrb.mxu2 %v686_v9 }
 0x112   : > { %814 = vmatpush.bf16.msra.mxu0 %v431_v40  ;;  %781 = vmatpush.bf16.msrb.mxu3 %v687_v45  ;;  %v892_v40 = vpop.permute.xlu2 %891 }
 0x113   : > { %833 = vmatpush.bf16.msra.mxu1 %v432_v44 }
 0x114   : > { %1151 = vmatmul.msk.bf16.vlgmr.msrb.gmra.mxu2 %vm710_vm1, %v1183_v36 }
 0x115   : > { %851 = vmatpush.bf16.msra.mxu2 %v437_v6  ;;  %1153 = vmatmul.msk.bf16.vlgmr.msrb.gmra.mxu3 %vm710_vm1, %v1183_v36 }
 0x116   : > { %870 = vmatpush.bf16.msra.mxu3 %v438_v10  ;;  %815 = vmatpush.bf16.msra.mxu0 %v427_v59 }
 0x117   : > { %834 = vmatpush.bf16.msra.mxu1 %v428_v46 }
 0x119   : > { %852 = vmatpush.bf16.msra.mxu2 %v433_v61  ;;  %v902_v61 = vpop.permute.xlu1 %901 }
 0x11a   : > { %871 = vmatpush.bf16.msra.mxu3 %v434_v7  ;;  %816 = vmatpush.bf16.msra.mxu0 %v423_v17 }
 0x11b   : > { %835 = vmatpush.bf16.msra.mxu1 %v424_v20 }
 0x11d   : > { %853 = vmatpush.bf16.msra.mxu2 %v429_v21  ;;  %1148 = vmatmul.msk.bf16.gmra.mxu0 %vm710_vm1, %v1184_v56 }
 0x11e   : > { %872 = vmatpush.bf16.msra.mxu3 %v430_v55 }
 0x120   : > { %1150 = vmatmul.msk.bf16.gmra.mxu1 %vm710_vm1, %v1184_v56 }
 0x121   : > { %854 = vmatpush.bf16.msra.mxu2 %v425_v15 }
 0x122   : > { %873 = vmatpush.bf16.msra.mxu3 %v426_v26 }
 0x124   : > { %1152 = vmatmul.msk.bf16.gmra.mxu2 %vm710_vm1, %v1184_v56 }
 0x125   : > { %1154 = vmatmul.msk.bf16.gmra.mxu3 %vm710_vm1, %v1184_v56 }
 0x12d   : > { %1163 = vmatmul.msk.bf16.vlgmr.msra.gmra.mxu0 %vm710_vm1, %v1181_v51 }
 0x130   : > { %1165 = vmatmul.msk.bf16.vlgmr.msra.gmra.mxu1 %vm710_vm1, %v1181_v51 }
 0x134   : > { %1167 = vmatmul.msk.bf16.vlgmr.msra.gmra.mxu2 %vm710_vm1, %v1181_v51 }
 0x135   : > { %1169 = vmatmul.msk.bf16.vlgmr.msra.gmra.mxu3 %vm710_vm1, %v1181_v51 }
 0x13d   : > { %1164 = vmatmul.msk.bf16.gmra.mxu0 %vm710_vm1, %v1182_v29 }
 0x140   : > { %1166 = vmatmul.msk.bf16.gmra.mxu1 %vm710_vm1, %v1182_v29 }
 0x144   : > { %1168 = vmatmul.msk.bf16.gmra.mxu2 %vm710_vm1, %v1182_v29 }
 0x145   : > { %1170 = vmatmul.msk.bf16.gmra.mxu3 %vm710_vm1, %v1182_v29 }
 0x18a   : > { %v726_v30 = vpop.f32.mrf.mxu0 }
 0x18d   : > { %v745_v31 = vpop.f32.mrf.mxu1 }
 0x192   : > { %v728_v32 = vpop.f32.mrf.mxu0 }
 0x195   : > { %v747_v33 = vpop.f32.mrf.mxu1 }
 0x197   : > { %v764_v34 = vpop.f32.mrf.mxu2 }
 0x198   : > { %v783_v52 = vpop.f32.mrf.mxu3 }
 0x19a   : > { %v731_v2 = vpop.f32.mrf.mxu0 }
 0x19d   : > { %v750_v27 = vpop.f32.mrf.mxu1 }
 0x19f   : > { %v766_v35 = vpop.f32.mrf.mxu2 }
 0x1a0   : > { %v785_v47 = vpop.f32.mrf.mxu3 }
 0x1a2   : > { %v733_v36 = vpop.f32.mrf.mxu0 }
 0x1a5   : > { %v752_v37 = vpop.f32.mrf.mxu1 }
 0x1a7   : > { %v1818_v48 = vpop.f32.mrf.mxu2 }
 0x1a8   : > { %v1820_v28 = vpop.f32.mrf.mxu3 }
 0x1aa   : > { %v818_v38 = vpop.f32.mrf.mxu0 }
 0x1ab   : > { %v819_v43 = vadd.f32 %v818_v38, %v726_v30  ;;  %v907_v30 = vpop.permute.xlu2 %906 }
 0x1ad   : > { %v837_v39 = vpop.f32.mrf.mxu1  ;;  %v909_v42 = vadd.f32 %v892_v40, %v819_v43 }
 0x1ae   : > { %v838_v41 = vadd.f32 %v837_v39, %v745_v31 }
 0x1af   : > { %v925_v57 = vmax.f32 %v909_v42, 0.0  ;;  %v1823_v53 = vpop.f32.mrf.mxu2 }
 0x1b0   : > { %v910_v49 = vadd.f32 %v892_v40, %v838_v41  ;;  %v1825_v8 = vpop.f32.mrf.mxu3 }
 0x1b2   : > { %v926_v44 = vmax.f32 %v910_v49, 0.0  ;;  %v820_v50 = vpop.f32.mrf.mxu0 }
 0x1b3   : > { %v821_v63 = vadd.f32 %v820_v50, %v728_v32 }
 0x1b4   : > { %v941_v58 = vpack.c.bf16 %v926_v44, %v925_v57 }
 0x1b5   : > { %v839_v0 = vpop.f32.mrf.mxu1  ;;  %v913_v6 = vadd.f32 %v897_v54, %v821_v63 }
 0x1b6   : > { %949 = vst [vmem:[%s1827_s22] sm:$0xff] %v941_v58  ;;  %v840_v5 = vadd.f32 %v839_v0, %v747_v33 }
 0x1b7   : > { %v929_v10 = vmax.f32 %v913_v6, 0.0  ;;  %v856_v59 = vpop.f32.mrf.mxu2 }
 0x1b8   : > { %v914_v9 = vadd.f32 %v897_v54, %v840_v5  ;;  %v857_v12 = vadd.f32 %v856_v59, %v764_v34  ;;  %v875_v13 = vpop.f32.mrf.mxu3 }
 0x1b9   : > { %v876_v45 = vadd.f32 %v875_v13, %v783_v52 }
 0x1ba   : > { %v930_v11 = vmax.f32 %v914_v9, 0.0  ;;  %v911_v3 = vadd.f32 %v892_v40, %v857_v12  ;;  %v823_v14 = vpop.f32.mrf.mxu0 }
 0x1bb   : > { %v912_v16 = vadd.f32 %v892_v40, %v876_v45  ;;  %v824_v1 = vadd.f32 %v823_v14, %v731_v2 }
 0x1bc   : > { %v943_v46 = vpack.c.bf16 %v930_v11, %v929_v10  ;;  %v927_v7 = vmax.f32 %v911_v3, 0.0 }
 0x1bd   : > { %v842_v4 = vpop.f32.mrf.mxu1  ;;  %v928_v18 = vmax.f32 %v912_v16, 0.0  ;;  %v917_v19 = vadd.f32 %v902_v61, %v824_v1 }
 0x1be   : > { %951 = vst [vmem:[%s1827_s22 + $0x10] sm:$0xff] %v943_v46  ;;  %v843_v17 = vadd.f32 %v842_v4, %v750_v27 }
 0x1bf   : > { %v942_v60 = vpack.c.bf16 %v928_v18, %v927_v7  ;;  %v933_v62 = vmax.f32 %v917_v19, 0.0  ;;  %v858_v21 = vpop.f32.mrf.mxu2 }
 0x1c0   : > { %v918_v20 = vadd.f32 %v902_v61, %v843_v17  ;;  %v859_v22 = vadd.f32 %v858_v21, %v766_v35  ;;  %v877_v24 = vpop.f32.mrf.mxu3 }
 0x1c1   : > { %950 = vst [vmem:[%s1827_s22 + $0x8] sm:$0xff] %v942_v60  ;;  %v878_v25 = vadd.f32 %v877_v24, %v785_v47 }
 0x1c2   : > { %v934_v55 = vmax.f32 %v918_v20, 0.0  ;;  %v915_v56 = vadd.f32 %v897_v54, %v859_v22  ;;  %v825_v15 = vpop.f32.mrf.mxu0 }
 0x1c3   : > { %v916_v26 = vadd.f32 %v897_v54, %v878_v25  ;;  %v826_v51 = vadd.f32 %v825_v15, %v733_v36 }
 0x1c4   : > { %v945_v23 = vpack.c.bf16 %v934_v55, %v933_v62  ;;  %v931_v31 = vmax.f32 %v915_v56, 0.0 }
 0x1c5   : > { %v844_v29 = vpop.f32.mrf.mxu1  ;;  %v932_v33 = vmax.f32 %v916_v26, 0.0  ;;  %v921_v34 = vadd.f32 %v907_v30, %v826_v51 }
 0x1c6   : > { %953 = vst [vmem:[%s1827_s22 + $0x20] sm:$0xff] %v945_v23  ;;  %v845_v32 = vadd.f32 %v844_v29, %v752_v37 }
 0x1c7   : > { %v944_v2 = vpack.c.bf16 %v932_v33, %v931_v31  ;;  %v937_v27 = vmax.f32 %v921_v34, 0.0  ;;  %v861_v35 = vpop.f32.mrf.mxu2 }
 0x1c8   : > { %v922_v52 = vadd.f32 %v907_v30, %v845_v32  ;;  %v862_v38 = vadd.f32 %v861_v35, %v1818_v48  ;;  %v880_v43 = vpop.f32.mrf.mxu3 }
 0x1c9   : > { %952 = vst [vmem:[%s1827_s22 + $0x18] sm:$0xff] %v944_v2  ;;  %v881_v36 = vadd.f32 %v880_v43, %v1820_v28 }
 0x1ca   : > { %v938_v47 = vmax.f32 %v922_v52, 0.0  ;;  %v919_v37 = vadd.f32 %v902_v61, %v862_v38 }
 0x1cb   : > { %v920_v40 = vadd.f32 %v902_v61, %v881_v36 }
 0x1cc   : > { %v947_v39 = vpack.c.bf16 %v938_v47, %v937_v27  ;;  %v935_v41 = vmax.f32 %v919_v37, 0.0 }
 0x1cd   : > { %v936_v42 = vmax.f32 %v920_v40, 0.0 }
 0x1ce   : > { %955 = vst [vmem:[%s1827_s22 + $0x30] sm:$0xff] %v947_v39 }
 0x1cf   : > { %v946_v49 = vpack.c.bf16 %v936_v42, %v935_v41  ;;  %v863_v57 = vpop.f32.mrf.mxu2 }
 0x1d0   : > { %v864_v48 = vadd.f32 %v863_v57, %v1823_v53  ;;  %v882_v44 = vpop.f32.mrf.mxu3 }
 0x1d1   : > { %954 = vst [vmem:[%s1827_s22 + $0x28] sm:$0xff] %v946_v49  ;;  %v883_v28 = vadd.f32 %v882_v44, %v1825_v8 }
 0x1d2   : > { %v923_v58 = vadd.f32 %v907_v30, %v864_v48 }
 0x1d3   : > { %v924_v50 = vadd.f32 %v907_v30, %v883_v28 }
 0x1d4   : > { %v939_v63 = vmax.f32 %v923_v58, 0.0 }
 0x1d5   : > { %v940_v0 = vmax.f32 %v924_v50, 0.0 }
 0x1d7   : > { %v948_v54 = vpack.c.bf16 %v940_v0, %v939_v63 }
 0x1d9   : > { %956 = vst [vmem:[%s1827_s22 + $0x38] sm:$0xff] %v948_v54 }
 0x1da   : > { %1365 = shalt.err (!%p1362_p11)
}
 0x1db   : > { %s1446_s29 = smov 256   ;;  %s1447_s22 = smov 512  }
 0x1dc   : > { %s1448_s10 = smov 16  }
 0x1dd   : > { %1189 = dma.vmem_to_hbm [thread:$0]  (%p1554_p9), %s973_s18, 1024, %s975_s13, %s958_s9, %s1446_s29, %s1447_s22, %s1448_s10  }
 0x1de PF: > { %s1923_s19 = sld [smem:[#allocation11_spill]]  ;;  %p1203_p13 = scmp.ge.s32.totalorder %s1440_s8, 2 }
 0x1e0   : > { %p1199_p0 = pnand %p1203_p13, %p1560_p12 }
 0x1e2   : > { %p1200_p1 = pneg %p1199_p0 }
 0x1e4   : > { %s989_s12 = sand.u32 1, %s1923_s19  }
 0x1e5   : > { %s990_s11 = scalar_lea.sflag [#allocation4], %s989_s12 }
 0x1e6   : > { %1407 = dma.done.wait (%p1200_p1), %s990_s11, 1024  }
 0x1e7   : > { %1409 = vsyncadd (%p1200_p1), %s990_s11, 4294966272  ;;  %s26_s8 = sadd.s32 1, %s1440_s8   ;;  %s1925_s27 = sld [smem:[#allocation12_spill]] }
 0x1e8   : > { %p23_p2 = scmp.ge.s32.totalorder %s26_s8, 6   ;;  %s1926_s26 = sld [smem:[#allocation19_spill]] }
 0x1e9   : > { %s1927_s15 = sld [smem:[#allocation14_spill]]  ;;  %s1930_s24 = smov %s1416_s25 }
 0x1ea   : > { %s1928_s29 = sld [smem:[#allocation15_spill]]  ;;  %s1933_s28 = smov %s1436_s30 }
 0x1eb   : > { %s1929_s20 = sld [smem:[#allocation16_spill]] }
 0x1ed   : > { %s1931_s25 = smov %s1925_s27  ;;  %25 = sbr.rel (!%p23_p2) target bundleno = 12 (0xc), region = 106 }
 0x1ef   : > { %s1932_s27 = smov %s1927_s15 }
 0x1f1   : > { %s1934_s30 = smov %s1929_s20 }
 0x1f2   :  { %996 = vsyncpa [#allocation3], 1 }
 0x1f3   :  { %998 = vsyncpa [#allocation3 + $0x1], 1 }
 0x1f4   :  { %999 = vsyncpa [#allocation6], 1 }
 0x1f5   :  { %1001 = vsyncpa [#allocation6 + $0x1], 1 }
 0x1f6   :  { %1002 = vsyncpa [#allocation4], 1 }
 0x1f7   :  { %1004 = vsyncpa [#allocation4 + $0x1], 1 }

</bundles_post_ra>
